<compile_context>
chip_gen: v5e
topology: v5e:2x2
jax: 0.10.0
libtpu: 0.0.40
codegen_flags: <defaults>
</compile_context>

<pallas_src>
import math

import jax
import jax.numpy as jnp
from jax.experimental import pallas as pl
from jax.experimental.pallas import tpu as pltpu


# --------------------------------------------------------------------------- #
# helpers
# --------------------------------------------------------------------------- #
def _round_up(x: int, m: int) -> int:
    return -(-x // m) * m


def _pick_divisor(total: int, cap: int, unit: int = 128) -> int:
    """Largest multiple of `unit` that divides `total` and is <= cap.

    `total` is always a multiple of `unit`, so `unit` is a valid fallback.
    """
    best = unit
    d = unit
    cap = min(cap, total)
    while d <= cap:
        if total % d == 0:
            best = d
        d += unit
    return best


def _vmem_capacity_bytes() -> int:
    try:
        info = pltpu.get_tpu_info()
        cap = getattr(info, "vmem_capacity_bytes", None)
        if cap:
            return int(cap)
    except Exception:
        pass
    # Conservative fallback: v7x has 64 MiB per TensorCore (smallest of the 3).
    return 64 * 1024 * 1024


def _choose_tiles(m, k_pad, e_pad, in_item, out_item,
                  tile_m=None, tile_k=None, tile_n=None):
    """Pick (tile_m, tile_k, tile_n, vmem_limit) from the actual VMEM capacity."""
    cap = _vmem_capacity_bytes()
    budget = int(cap * 0.70)            # leave compiler / pipeline headroom
    sub = 16 if in_item <= 2 else 8     # bf16 packs 16 rows per vreg sublane grp

    # ---- rows: MXU-aligned where possible, avoid >12.5% padding waste -------
    if tile_m is None:
        tm = _round_up(min(m, 512), sub)
        for cand in (512, 256, 128):
            if m >= cand and (_round_up(m, cand) - m) * 8 <= m:
                tm = cand
                break
        # v7x has 2 TensorCores: make sure the parallel M axis has >=2 steps
        # when the tile is big enough to split without starving the MXU.
        if -(-m // tm) < 2 and tm >= 256:
            tm = tm // 2
    else:
        tm = _round_up(tile_m, sub)

    # ---- contraction / output-lane tiles: 128-multiple divisors -------------
    if tile_k is None:
        tk = _pick_divisor(k_pad, min(k_pad, 1024))
    else:
        tk = _pick_divisor(k_pad, max(128, _round_up(tile_k, 128)))
    if tile_n is None:
        tn = e_pad                       # prefer weight-resident (E un-tiled)
    else:
        tn = _pick_divisor(e_pad, max(128, _round_up(tile_n, 128)))

    def wset(tm_, tk_, tn_):
        s = 2 * tm_ * tk_ * in_item      # feats tiles (double-buffered)
        s += 2 * tk_ * tn_ * in_item     # weight tiles (double-buffered)
        s += 2 * tm_ * tn_ * out_item    # output tiles
        if k_pad // tk_ > 1:
            s += tm_ * tn_ * 4           # f32 accumulator scratch
        return s

    # Shrink until the double-buffered working set fits the budget:
    # contraction depth first, then output lanes, then rows.
    while wset(tm, tk, tn) > budget:
        if tk > 128:
            tk = _pick_divisor(k_pad, max(128, tk // 2))
        elif tn > 128:
            tn = _pick_divisor(e_pad, max(128, tn // 2))
        elif tm > sub:
            tm = max(sub, _round_up(tm // 2, sub))
        else:
            break

    vmem_limit = min(int(cap * 0.9), max(wset(tm, tk, tn) + (4 << 20), 32 << 20))
    return tm, tk, tn, vmem_limit


# --------------------------------------------------------------------------- #
# kernels
# --------------------------------------------------------------------------- #
def _mm_kernel_single(x_ref, w_ref, o_ref):
    # K fits in one tile: single MXU dot, no accumulator, no init/finalize.
    o_ref[...] = jnp.dot(
        x_ref[...], w_ref[...], preferred_element_type=jnp.float32
    ).astype(o_ref.dtype)


def _mm_kernel_acc(x_ref, w_ref, o_ref, acc_ref):
    # K tiled: f32 VMEM accumulator resident across the trailing K axis.
    @pl.when(pl.program_id(2) == 0)
    def _():
        acc_ref[...] = jnp.zeros_like(acc_ref)

    acc_ref[...] += jnp.dot(
        x_ref[...], w_ref[...], preferred_element_type=jnp.float32
    )

    @pl.when(pl.program_id(2) == pl.num_programs(2) - 1)
    def _():
        o_ref[...] = acc_ref[...].astype(o_ref.dtype)


# --------------------------------------------------------------------------- #
# wrapper
# --------------------------------------------------------------------------- #
def _prepare_weight(weight, k_pad, e_pad, compute_dtype):
    """Transpose (E,K)->(K,E), cast, pad. Call ONCE and cache (hoisted)."""
    e, k = weight.shape
    w_t = weight.T
    if compute_dtype is not None and w_t.dtype != compute_dtype:
        w_t = w_t.astype(compute_dtype)
    if (k_pad, e_pad) != (k, e):
        w_t = jnp.pad(w_t, ((0, k_pad - k), (0, e_pad - e)))
    return w_t


def _matmul_pallas(feats, w_kp_ep, k, e, *, compute_dtype,
                   tile_m=None, tile_k=None, tile_n=None):
    """out[:m, :e] = feats[:, :k] @ W.T   (W pre-transposed/padded to w_kp_ep)."""
    m = feats.shape[0]
    k_pad, e_pad = w_kp_ep.shape
    out_dtype = feats.dtype

    in_item = (jnp.dtype(compute_dtype).itemsize
               if compute_dtype is not None else feats.dtype.itemsize)
    out_item = jnp.dtype(out_dtype).itemsize

    tm, tk, tn, vmem_limit = _choose_tiles(
        m, k_pad, e_pad, in_item, out_item, tile_m, tile_k, tile_n)

    m_pad = _round_up(max(m, tm), tm)

    x = feats
    if compute_dtype is not None and x.dtype != compute_dtype:
        x = x.astype(compute_dtype)
    if (m_pad, k_pad) != (m, k):
        x = jnp.pad(x, ((0, m_pad - m), (0, k_pad - k)))

    m_tiles = m_pad // tm
    n_tiles = e_pad // tn
    k_tiles = k_pad // tk

    # Realistic traffic: the weight block is only resident (read once) when its
    # block index never changes; otherwise it is re-streamed per M tile, and
    # feats rows are re-read per N tile.
    w_reads = 1 if (k_tiles == 1 and n_tiles == 1) else m_tiles
    x_reads = n_tiles
    cost = pl.CostEstimate(
        flops=2 * m_pad * k_pad * e_pad,
        bytes_accessed=(x_reads * m_pad * k_pad * in_item
                        + w_reads * k_pad * e_pad * in_item
                        + m_pad * e_pad * out_item),
        transcendentals=0,
    )

    if k_tiles == 1:
        # Weight-resident / single-K-tile fast path: no accumulator scratch.
        grid = (m_tiles, n_tiles)
        in_specs = [
            pl.BlockSpec((tm, tk), lambda i, j: (i, 0)),
            pl.BlockSpec((tk, tn), lambda i, j: (0, j)),
        ]
        out_spec = pl.BlockSpec((tm, tn), lambda i, j: (i, j))
        kernel = _mm_kernel_single
        scratch = []
        dims = ("parallel", "parallel")
    else:
        grid = (m_tiles, n_tiles, k_tiles)
        in_specs = [
            pl.BlockSpec((tm, tk), lambda i, j, kk: (i, kk)),
            pl.BlockSpec((tk, tn), lambda i, j, kk: (kk, j)),
        ]
        out_spec = pl.BlockSpec((tm, tn), lambda i, j, kk: (i, j))
        kernel = _mm_kernel_acc
        scratch = [pltpu.VMEM((tm, tn), jnp.float32)]
        dims = ("parallel", "parallel", "arbitrary")

    out_padded = pl.pallas_call(
        kernel,
        out_shape=jax.ShapeDtypeStruct((m_pad, e_pad), out_dtype),
        grid_spec=pltpu.PrefetchScalarGridSpec(
            num_scalar_prefetch=0,
            grid=grid,
            in_specs=in_specs,
            out_specs=out_spec,
            scratch_shapes=scratch,
        ),
        compiler_params=pltpu.CompilerParams(
            dimension_semantics=dims,
            vmem_limit_bytes=vmem_limit,
        ),
        cost_estimate=cost,
    )(x, w_kp_ep)

    if (m_pad, e_pad) != (m, e):
        out_padded = out_padded[:m, :e]
    return out_padded


class LinearPrepPallas:
    """Pallas-TPU equivalent of LinearPrep (fc without bias on node feats)."""

    def __init__(self, input_dim, n_nodes, embedding_dim=64, *,
                 key=None, weight=None, compute_dtype=jnp.bfloat16,
                 min_flops_for_pallas=1 << 22):
        del n_nodes  # unused by the reference forward as well
        if weight is None:
            bound = 1.0 / math.sqrt(input_dim)
            weight = jax.random.uniform(
                key, (embedding_dim, input_dim), jnp.float32,
                minval=-bound, maxval=bound)
        assert weight.shape == (embedding_dim, input_dim)
        self.weight = weight                   # PyTorch layout (E, K), for fallback
        self.input_dim = input_dim
        self.embedding_dim = embedding_dim
        self.output_dim = embedding_dim
        self.compute_dtype = compute_dtype
        self.min_flops_for_pallas = min_flops_for_pallas
        # Hoisted, done ONCE (not per forward call): transpose + cast + pad.
        self.k_pad = _round_up(input_dim, 128)
        self.e_pad = _round_up(embedding_dim, 128)
        self.w_prepped = _prepare_weight(weight, self.k_pad, self.e_pad,
                                         compute_dtype)

    def forward(self, ids, feats, layer_idx=0, *, force_pallas=False,
                tile_m=None, tile_k=None, tile_n=None):
        del ids, layer_idx  # unused, same as the reference module
        m, k = feats.shape
        assert k == self.input_dim, "input_dim mismatch"
        # Tiny problems: XLA's fused matmul beats any hand kernel.
        if (not force_pallas
                and 2 * m * k * self.embedding_dim < self.min_flops_for_pallas):
            return (feats @ self.weight.T).astype(feats.dtype)
        return _matmul_pallas(feats, self.w_prepped, k, self.embedding_dim,
                              compute_dtype=self.compute_dtype,
                              tile_m=tile_m, tile_k=tile_k, tile_n=tile_n)

    __call__ = forward


def linear_prep_forward(ids, feats, weight, layer_idx=0, *,
                        compute_dtype=jnp.bfloat16, force_pallas=False):
    """One-shot functional form (weight prep NOT cached; prefer the class)."""
    e, k = weight.shape
    mod = LinearPrepPallas(k, feats.shape[0], e, weight=weight,
                           compute_dtype=compute_dtype)
    return mod.forward(ids, feats, layer_idx, force_pallas=force_pallas)


# --------------------------------------------------------------------------- #
# demo / correctness check
# --------------------------------------------------------------------------- #
if __name__ == "__main__":
    key = jax.random.PRNGKey(0)
    k_w, k_f, k_w2, k_f2 = jax.random.split(key, 4)

    # ---- Case 1: module defaults (input_dim=32, n_nodes=8, embedding_dim=64),
    #      bf16 MXU feed + f32 accumulation, weight-resident fast path. --------
    input_dim, n_nodes, embedding_dim = 32, 8, 64
    bound = 1.0 / math.sqrt(input_dim)
    weight = jax.random.uniform(k_w, (embedding_dim, input_dim), jnp.float32,
                                minval=-bound, maxval=bound)
    feats = jax.random.normal(k_f, (n_nodes, input_dim), jnp.float32)
    ids = jnp.arange(n_nodes, dtype=jnp.int32)

    mod = LinearPrepPallas(input_dim, n_nodes, embedding_dim, weight=weight,
                           compute_dtype=jnp.bfloat16)
    # force_pallas=True so the demo exercises the kernel even at toy sizes
    # (production callers let the min_flops threshold route tiny N to XLA).
    out = jax.block_until_ready(mod.forward(ids, feats, force_pallas=True))
    ref_q = (feats.astype(jnp.bfloat16).astype(jnp.float32)
             @ weight.T.astype(jnp.bfloat16).astype(jnp.float32))
    assert out.shape == (n_nodes, embedding_dim)
    assert jnp.allclose(out, ref_q, atol=1e-3, rtol=1e-3)

    # ---- Case 2: f32 compute with forced K tiling (exercises the accumulator
    #      kernel path: grid K axis, pl.when init/finalize). ------------------
    input_dim2, n_nodes2 = 384, 16
    bound2 = 1.0 / math.sqrt(input_dim2)
    weight2 = jax.random.uniform(k_w2, (embedding_dim, input_dim2), jnp.float32,
                                 minval=-bound2, maxval=bound2)
    feats2 = jax.random.normal(k_f2, (n_nodes2, input_dim2), jnp.float32)
    ids2 = jnp.arange(n_nodes2, dtype=jnp.int32)

    mod2 = LinearPrepPallas(input_dim2, n_nodes2, embedding_dim, weight=weight2,
                            compute_dtype=None)  # keep f32 MXU feed
    out2 = jax.block_until_ready(
        mod2.forward(ids2, feats2, force_pallas=True, tile_k=128))
    ref2 = feats2 @ weight2.T
    assert out2.shape == (n_nodes2, embedding_dim)
    assert jnp.allclose(out2, ref2, atol=5e-2, rtol=5e-2)

    print("KERNEL_OK")
</pallas_src>

<mosaic_0001>
module attributes {stable_mosaic.version = 11 : i64} {
  func.func @_mm_kernel_single(%arg0: i32, %arg1: i32, %arg2: memref<16x128xbf16, #tpu.memory_space<vmem>>, %arg3: memref<128x128xbf16, #tpu.memory_space<vmem>>, %arg4: memref<16x128xf32, #tpu.memory_space<vmem>>) attributes {dimension_semantics = [#tpu.dimension_semantics<parallel>, #tpu.dimension_semantics<parallel>], iteration_bounds = array<i64: 1, 1>, scalar_prefetch = 0 : i64, scratch_operands = 0 : i64, tpu.core_type = #tpu.core_type<tc>, window_params = [{transform_indices = @transform_0, window_bounds = array<i64: 16, 128>}, {transform_indices = @transform_1, window_bounds = array<i64: 128, 128>}, {transform_indices = @transform_2, window_bounds = array<i64: 16, 128>}]} {
    %c0 = arith.constant 0 : index
    %c0_0 = arith.constant 0 : index
    %0 = vector.load %arg2[%c0, %c0_0] : memref<16x128xbf16, #tpu.memory_space<vmem>>, vector<16x128xbf16>
    %c0_1 = arith.constant 0 : index
    %c0_2 = arith.constant 0 : index
    %1 = vector.load %arg3[%c0_1, %c0_2] : memref<128x128xbf16, #tpu.memory_space<vmem>>, vector<128x128xbf16>
    %cst = arith.constant dense<0.000000e+00> : vector<16x128xf32>
    %2 = tpu.matmul %0, %1, %cst {dimension_numbers = #tpu.dot_dimension_numbers<[1], [0], [0], [1], [0, 0, 1, 1], [], []>} : vector<16x128xbf16>, vector<128x128xbf16>, vector<16x128xf32> -> vector<16x128xf32>
    %c0_3 = arith.constant 0 : index
    %c0_4 = arith.constant 0 : index
    %3 = vector.load %arg4[%c0_3, %c0_4] : memref<16x128xf32, #tpu.memory_space<vmem>>, vector<16x128xf32>
    tpu.vector_store %arg4[%c0_3, %c0_4], %2 {strides = array<i32>} : memref<16x128xf32, #tpu.memory_space<vmem>>, vector<16x128xf32>,
    return
  }
  func.func @transform_0(%arg0: i32, %arg1: i32) -> (i32, i32) {
    %c0_i32 = arith.constant 0 : i32
    %c0_i32_0 = arith.constant 0 : i32
    return %arg0, %c0_i32 : i32, i32
  }
  func.func @transform_1(%arg0: i32, %arg1: i32) -> (i32, i32) {
    %c0_i32 = arith.constant 0 : i32
    %c0_i32_0 = arith.constant 0 : i32
    return %c0_i32, %arg1 : i32, i32
  }
  func.func @transform_2(%arg0: i32, %arg1: i32) -> (i32, i32) {
    %c0_i32 = arith.constant 0 : i32
    return %arg0, %arg1 : i32, i32
  }
}

</mosaic_0001>

<bundles_post_ra>
// kernel: tpu_custom_call.1
= control target key start
LH: loop header
LB: loop body
LE: loop exit
PB: predicated region body
PF: predicated region fallthrough
CT: control target
= control target key end

     0   :  { %7 = vsyncpa [#allocation3], 0  ;;  %s313_s0 = inlined_call_operand.hbm [shape: bf16[16,128], index: 0, kind: input, shape index: {}]   ;;  %s314_s1 = inlined_call_operand.hbm [shape: bf16[128,128], index: 1, kind: input, shape index: {}]   ;;  %s315_s2 = inlined_call_operand.hbm [shape: f32[16,128], index: 2, kind: output, shape index: {}]  }
   0x1   :  { %8 = vsyncpa [#allocation6], 0 }
   0x2   :  { %9 = vsyncpa [#allocation4], 0  ;;  %s14_s11 = sshll.u32 %s313_s0, 4  ;;  %s282_s12 = smov [#allocation2]   ;;  %s15_s11 = int_to_ptr.hbm [resolvable:$true] %s14_s11 }
   0x3   :  { %s16_s13 = sshll.u32 %s282_s12, 4  ;;  %s27_s16 = sshll.u32 %s314_s1, 4  ;;  %s17_s13 = int_to_ptr.vmem [resolvable:$true] %s16_s13  ;;  %s28_s16 = int_to_ptr.hbm [resolvable:$true] %s27_s16 }
   0x4   :  { %s283_s17 = smov 64   ;;  %s284_s18 = smov 4  }
   0x5   :  { %22 = dma.hbm_to_vmem [thread:$0]  %s15_s11, 128, %s17_s13, [#allocation3], %s283_s17, %s283_s17, %s284_s18  }
   0x6   :  { %s285_s19 = smov [#allocation5]  }
   0x7   :  { %s29_s20 = sshll.u32 %s285_s19, 4  ;;  %s30_s20 = int_to_ptr.vmem [resolvable:$true] %s29_s20 }
   0x8   :  { %35 = dma.hbm_to_vmem [thread:$0]  %s28_s16, 1024, %s30_s20, [#allocation6], %s283_s17, %s283_s17, %s284_s18  }
   0x9   :  { %276 = dma.done.wait [#allocation3], 128  }
   0xa   :  { %277 = vsyncadd [#allocation3], 4294967168 }
   0xb   :  { %278 = dma.done.wait [#allocation6], 1024  }
   0xc   :  { %279 = vsyncadd [#allocation6], 4294966272  ;;  %v196_v0 = vld [vmem:[#allocation5 + $0x38] sm:$0xff]  ;;  %v195_v1 = vld [vmem:[#allocation5 + $0x30] sm:$0xff]  ;;  %s286_s0 = smov [#allocation7]   ;;  %s138_s23 = sshll.u32 %s315_s2, 4  ;;  %s139_s23 = int_to_ptr.hbm [resolvable:$true] %s138_s23 }
   0xd   :  { %116 = vmatpush.bf16.msra.mxu0 %v196_v0  ;;  %v194_v2 = vld [vmem:[#allocation5 + $0x28] sm:$0xff]  ;;  %v193_v3 = vld [vmem:[#allocation5 + $0x20] sm:$0xff]  ;;  %v192_v4 = vld [vmem:[#allocation5 + $0x18] sm:$0xff]  ;;  %s136_s1 = sshll.u32 %s286_s0, 4  ;;  %s287_s24 = smov 128   ;;  %s137_s1 = int_to_ptr.vmem [resolvable:$true] %s136_s1 }
   0xe   :  { %v191_v5 = vld [vmem:[#allocation5 + $0x10] sm:$0xff]  ;;  %v190_v6 = vld [vmem:[#allocation5 + $0x8] sm:$0xff]  ;;  %v189_v7 = vld [vmem:[#allocation5] sm:$0xff]  ;;  %s288_s25 = smov 8  }
   0xf   :  { %v188_v8 = vld [vmem:[#allocation2] sm:$0xff] }
  0x11   :  { %117 = vmatpush.bf16.msra.mxu0 %v195_v1 }
  0x15   :  { %118 = vmatpush.bf16.msra.mxu0 %v194_v2 }
  0x19   :  { %119 = vmatpush.bf16.msra.mxu0 %v193_v3 }
  0x1d   :  { %120 = vmatpush.bf16.msra.mxu0 %v192_v4 }
  0x21   :  { %121 = vmatpush.bf16.msra.mxu0 %v191_v5 }
  0x25   :  { %122 = vmatpush.bf16.msra.mxu0 %v190_v6 }
  0x29   :  { %123 = vmatpush.bf16.msra.mxu0 %v189_v7 }
  0x2c   :  { %124 = vmatmul.bf16.vlgmr.msra.gmra.mxu0 %v188_v8 }
  0xa9   :  { %v125_v9 = vpop.f32.mrf.mxu0 }
  0xaa   :  { %130 = vst [vmem:[#allocation7] sm:$0xff] %v125_v9 }
  0xb1   :  { %v127_v10 = vpop.f32.mrf.mxu0 }
  0xb2   :  { %131 = vst [vmem:[#allocation7 + $0x8] sm:$0xff] %v127_v10 }
  0xb3   :  { %144 = dma.vmem_to_hbm [thread:$0]  %s137_s1, 256, %s139_s23, [#allocation4], %s287_s24, %s287_s24, %s288_s25  }
  0xb4   :  { %280 = dma.done.wait [#allocation4], 256  }
  0xb5   :  { %281 = vsyncadd [#allocation4], 4294967040 }
  0xb6   :  { %149 = vsyncpa [#allocation3], 1 }
  0xb7   :  { %150 = vsyncpa [#allocation6], 1 }
  0xb8   :  { %151 = vsyncpa [#allocation4], 1 }

</bundles_post_ra>
